<compile_context>
chip_gen: v7x
topology: tpu7x:2x2x1
jax: 0.10.0
libtpu: 0.0.40
codegen_flags: <defaults>
</compile_context>

<pallas_src>
import functools

import jax
import jax.numpy as jnp
import numpy as np
from jax.experimental import pallas as pl
from jax.experimental.pallas import tpu as pltpu

AMIN = 1e-10
TOP_DB = 80.0
LANE = 128
SUBLANE = 8
_CORE_SPLIT = 2          # pass-1 core split (v7x has 2 TCs; harmless elsewhere)


# --------------------------- per-generation config ---------------------------
def _tpu_config():
    kind = ""
    try:
        kind = jax.devices()[0].device_kind.lower()
    except Exception:
        pass
    mib = 1024 * 1024
    if "v7" in kind or "7x" in kind:
        # v7x: 64 MiB VMEM / TC, 3.2 TB/s HBM, 2 TCs -> prefer dual-core two-pass
        return dict(vmem_limit_bytes=48 * mib, fused_max_bytes=8 * mib,
                    tile_bytes=4 * mib)
    if "v5" in kind or "v6" in kind:
        # v5e / v6e: 128 MiB VMEM, single TC -> big fused window, 8 MiB tiles
        return dict(vmem_limit_bytes=96 * mib, fused_max_bytes=24 * mib,
                    tile_bytes=8 * mib)
    # unknown generation: conservative
    return dict(vmem_limit_bytes=32 * mib, fused_max_bytes=4 * mib,
                tile_bytes=2 * mib)


# ----------------------------- lane-dense 2-D view ---------------------------
def _lane_dense_view(n, last_dim, tile_bytes):
    """Pick (rows, cols): cols a multiple of 128 dividing n, 8-row block <= tile."""
    cap = max(LANE, tile_bytes // (4 * SUBLANE))
    best = 0        # best divisor giving >= 8 rows
    best_any = 0
    if n % LANE == 0:
        m = n // LANE
        dcap = max(1, cap // LANE)
        i = 1
        while i * i <= m:
            if m % i == 0:
                for d in (i, m // i):
                    if d <= dcap:
                        if d > best_any:
                            best_any = d
                        if n // (d * LANE) >= SUBLANE and d > best:
                            best = d
            i += 1
    d = best or best_any
    if d:
        return n // (d * LANE), d * LANE
    return max(1, n // last_dim), last_dim       # fallback: natural 2-D view


# ------------------------- fused single-pass kernel --------------------------
def _fused_kernel(x_ref, o_ref):
    x = x_ref[...]                                   # whole spectrogram in VMEM
    xmax = jnp.max(x)                                # ref = np.max
    ref_db = 10.0 * jnp.log10(jnp.maximum(jnp.abs(xmax), AMIN))
    log_spec = 10.0 * jnp.log10(jnp.maximum(x, AMIN)) - ref_db
    # log10 is monotone on the non-negative power input -> peak of log_spec
    peak_db = 10.0 * jnp.log10(jnp.maximum(xmax, AMIN)) - ref_db
    o_ref[...] = jnp.maximum(log_spec, peak_db - TOP_DB)


def _normalise_fused(x2d, vmem_limit_bytes):
    R, C = x2d.shape
    # No grid / no BlockSpecs: one invocation, single-buffered full-array VMEM
    # blocks (double-buffering a 1-step grid would just waste VMEM).
    return pl.pallas_call(
        _fused_kernel,
        out_shape=jax.ShapeDtypeStruct((R, C), jnp.float32),
        compiler_params=pltpu.CompilerParams(vmem_limit_bytes=vmem_limit_bytes),
    )(x2d)


# -------------------------------- two-pass path -------------------------------
def _max_kernel(x_ref, pmax_ref, acc_ref, *, rows, core_offset):
    ci = pl.program_id(0)          # core-split slice
    bj = pl.program_id(1)          # block within this slice

    @pl.when(bj == 0)
    def _():
        acc_ref[...] = jnp.full(acc_ref.shape, -jnp.inf, acc_ref.dtype)

    blk = x_ref[...]                                   # (br, C)
    br, c = blk.shape
    # Mask rows past the true extent (ragged last block / duplicated tail block)
    # with -inf BEFORE folding -- OOB rows of a partial block contain garbage.
    start = (ci * core_offset + bj) * br
    row_ids = jax.lax.broadcasted_iota(jnp.int32, blk.shape, 0) + start
    masked = jnp.where(row_ids < rows, blk, -jnp.inf)

    if br % SUBLANE == 0:
        # Layout-free fold onto the (8, C) accumulator: pure VPU element-wise max.
        folded = jnp.max(masked.reshape(br // SUBLANE, SUBLANE, c), axis=0)
    else:
        # br == full extent and not 8-aligned (single tiny block): reduce directly.
        folded = jnp.broadcast_to(jnp.max(masked, axis=0, keepdims=True),
                                  acc_ref.shape)
    acc_ref[...] = jnp.maximum(acc_ref[...], folded)

    # One expensive cross-lane/sublane reduce per core slice, at its last step.
    @pl.when(bj == pl.num_programs(1) - 1)
    def _():
        pmax_ref[...] = jnp.max(acc_ref[...], keepdims=True)


def _power_to_db_kernel(scal_ref, x_ref, o_ref):
    # scal_ref (SMEM, f32[2]): [0] = ref_db, [1] = floor_db (= peak_db - top_db)
    ref_db = scal_ref[0]
    floor_db = scal_ref[1]
    x = jnp.maximum(x_ref[...], jnp.float32(AMIN))
    o_ref[...] = jnp.maximum(10.0 * jnp.log10(x) - ref_db, floor_db)


def _normalise_two_pass(x2d, tile_bytes, vmem_limit_bytes):
    R, C = x2d.shape

    # Large row blocks, full frame axis per block, ~tile_bytes each.
    br = max(SUBLANE, (tile_bytes // (4 * C)) // SUBLANE * SUBLANE)
    if br >= R:
        br = R                                   # full-extent block (exempt dims)
    nblocks = pl.cdiv(R, br)
    nbpc = pl.cdiv(nblocks, _CORE_SPLIT)         # blocks per core slice
    off = nblocks - nbpc                         # slice-1 start (may overlap: ok for max)

    # ---- pass 1: global max, (parallel core-split, arbitrary accumulate) ----
    pmax = pl.pallas_call(
        functools.partial(_max_kernel, rows=R, core_offset=off),
        out_shape=jax.ShapeDtypeStruct((_CORE_SPLIT, 1), jnp.float32),
        grid=(_CORE_SPLIT, nbpc),
        in_specs=[pl.BlockSpec((br, C), lambda ci, bj: (ci * off + bj, 0))],
        out_specs=pl.BlockSpec((1, 1), lambda ci, bj: (ci, 0)),
        scratch_shapes=[pltpu.VMEM((SUBLANE, C), jnp.float32)],
        compiler_params=pltpu.CompilerParams(
            dimension_semantics=("parallel", "arbitrary"),
            vmem_limit_bytes=vmem_limit_bytes),
    )(x2d)

    # ---- scalar glue: combine per-core partials, librosa constants ----
    xmax = jnp.max(pmax)
    ref_db = 10.0 * jnp.log10(jnp.maximum(jnp.abs(xmax), AMIN))
    floor_db = 10.0 * jnp.log10(jnp.maximum(xmax, AMIN)) - ref_db - TOP_DB
    scalars = jnp.stack([ref_db, floor_db]).astype(jnp.float32)

    # ---- pass 2: elementwise dB + clip, lane-dense blocks, parallel grid ----
    out2d = pl.pallas_call(
        _power_to_db_kernel,
        out_shape=jax.ShapeDtypeStruct((R, C), jnp.float32),
        grid=(nblocks,),
        in_specs=[
            pl.BlockSpec(memory_space=pltpu.SMEM),          # [ref_db, floor_db]
            pl.BlockSpec((br, C), lambda i: (i, 0)),
        ],
        out_specs=pl.BlockSpec((br, C), lambda i: (i, 0)),
        compiler_params=pltpu.CompilerParams(
            dimension_semantics=("parallel",),
            vmem_limit_bytes=vmem_limit_bytes),
    )(scalars, x2d)
    return out2d


# ----------------------------------- wrapper ----------------------------------
def normalise_mel_spec(x, *, force_two_pass=False, tile_bytes=None):
    """Equivalent of torch.from_numpy(librosa.power_to_db(x, ref=np.max))."""
    orig_shape = x.shape
    x = jnp.asarray(x, jnp.float32)
    cfg = _tpu_config()
    if tile_bytes is None:
        tile_bytes = cfg["tile_bytes"]

    n = int(x.size)
    last_dim = int(orig_shape[-1]) if x.ndim >= 1 else 1
    R, C = _lane_dense_view(n, last_dim, tile_bytes)
    x2d = x.reshape(R, C)

    if (not force_two_pass) and n * 4 <= cfg["fused_max_bytes"]:
        out2d = _normalise_fused(x2d, cfg["vmem_limit_bytes"])
    else:
        out2d = _normalise_two_pass(x2d, tile_bytes, cfg["vmem_limit_bytes"])
    return out2d.reshape(orig_shape)


# ------------------------------------ test ------------------------------------
def _reference(x):
    xn = np.asarray(x, dtype=np.float32)
    ref_value = np.abs(xn.max())
    log_spec = 10.0 * np.log10(np.maximum(AMIN, xn))
    log_spec -= 10.0 * np.log10(np.maximum(AMIN, ref_value))
    return np.maximum(log_spec, log_spec.max() - TOP_DB)


if __name__ == "__main__":
    k1, k2 = jax.random.split(jax.random.PRNGKey(0))

    # (batch, n_mels, n_frames) power spectrogram, frame axis NOT 128-aligned.
    mag = jax.random.uniform(k1, (2, 16, 250), jnp.float32, 0.0, 4.0)
    x1 = mag * mag
    exp1 = _reference(x1)

    out = jax.block_until_ready(normalise_mel_spec(x1))                # fused path
    np.testing.assert_allclose(np.asarray(out), exp1, rtol=1e-5, atol=1e-4)

    out = jax.block_until_ready(normalise_mel_spec(x1, force_two_pass=True))
    np.testing.assert_allclose(np.asarray(out), exp1, rtol=1e-5, atol=1e-4)

    # Ragged last block, multi-block accumulation, duplicated tail block on the
    # second core slice, partial-block output stores: tiny tiles force them all.
    mag = jax.random.uniform(k2, (3, 17, 250), jnp.float32, 0.0, 4.0)
    x2 = mag * mag
    out = jax.block_until_ready(
        normalise_mel_spec(x2, force_two_pass=True, tile_bytes=8 * 1024))
    np.testing.assert_allclose(np.asarray(out), _reference(x2), rtol=1e-5, atol=1e-4)

    # 128-divisible element count -> lane-dense (8, 1024) view, fused path.
    mag = jax.random.uniform(k1, (2, 16, 256), jnp.float32, 0.0, 4.0)
    x3 = mag * mag
    out = jax.block_until_ready(normalise_mel_spec(x3))
    np.testing.assert_allclose(np.asarray(out), _reference(x3), rtol=1e-5, atol=1e-4)

    print("KERNEL_OK")
</pallas_src>

<mosaic_0001>
module attributes {stable_mosaic.version = 11 : i64} {
  func.func @_fused_kernel(%arg0: memref<32x250xf32, #tpu.memory_space<vmem>>, %arg1: memref<32x250xf32, #tpu.memory_space<vmem>>) attributes {dimension_semantics = [], scalar_prefetch = 0 : i64, scratch_operands = 0 : i64, tpu.core_type = #tpu.core_type<tc>} {
    %c0 = arith.constant 0 : index
    %c0_0 = arith.constant 0 : index
    %0 = vector.load %arg0[%c0, %c0_0] : memref<32x250xf32, #tpu.memory_space<vmem>>, vector<32x250xf32>
    %1 = vector.shape_cast %0 : vector<32x250xf32> to vector<1x32x250xf32>
    %cst = arith.constant dense<0xFF800000> : vector<1xf32>
    %2 = vector.multi_reduction <maximumf>, %1, %cst [1, 2] : vector<1x32x250xf32> to vector<1xf32>
    %3 = vector.shape_cast %2 : vector<1xf32> to vector<1x1x1xf32>
    %4 = vector.extract %3[0, 0, 0] : f32 from vector<1x1x1xf32>
    %5 = math.absf %4 : f32
    %cst_1 = arith.constant 1.000000e-10 : f32
    %6 = arith.maximumf %5, %cst_1 : f32
    %7 = math.log %6 : f32
    %cst_2 = arith.constant 0.434294492 : f32
    %8 = arith.mulf %7, %cst_2 : f32
    %cst_3 = arith.constant 1.000000e+01 : f32
    %9 = arith.mulf %cst_3, %8 : f32
    %cst_4 = arith.constant 1.000000e-10 : f32
    %10 = vector.broadcast %cst_4 : f32 to vector<32x250xf32>
    %11 = arith.maximumf %0, %10 : vector<32x250xf32>
    %12 = math.log %11 : vector<32x250xf32>
    %cst_5 = arith.constant 0.434294492 : f32
    %13 = vector.broadcast %cst_5 : f32 to vector<32x250xf32>
    %14 = arith.mulf %12, %13 : vector<32x250xf32>
    %cst_6 = arith.constant 1.000000e+01 : f32
    %15 = vector.broadcast %cst_6 : f32 to vector<32x250xf32>
    %16 = arith.mulf %15, %14 : vector<32x250xf32>
    %17 = vector.broadcast %9 : f32 to vector<32x250xf32>
    %18 = arith.subf %16, %17 : vector<32x250xf32>
    %cst_7 = arith.constant 1.000000e-10 : f32
    %19 = arith.maximumf %4, %cst_7 : f32
    %20 = math.log %19 : f32
    %cst_8 = arith.constant 0.434294492 : f32
    %21 = arith.mulf %20, %cst_8 : f32
    %cst_9 = arith.constant 1.000000e+01 : f32
    %22 = arith.mulf %cst_9, %21 : f32
    %23 = arith.subf %22, %9 : f32
    %cst_10 = arith.constant 8.000000e+01 : f32
    %24 = arith.subf %23, %cst_10 : f32
    %25 = vector.broadcast %24 : f32 to vector<32x250xf32>
    %26 = arith.maximumf %18, %25 : vector<32x250xf32>
    %c0_11 = arith.constant 0 : index
    %c0_12 = arith.constant 0 : index
    %27 = vector.load %arg1[%c0_11, %c0_12] : memref<32x250xf32, #tpu.memory_space<vmem>>, vector<32x250xf32>
    tpu.vector_store %arg1[%c0_11, %c0_12], %26 {strides = array<i32>} : memref<32x250xf32, #tpu.memory_space<vmem>>, vector<32x250xf32>,
    return
  }
}

</mosaic_0001>

<bundles_post_ra>
// kernel: tpu_custom_call.1
= control target key start
LH: loop header
LB: loop body
LE: loop exit
PB: predicated region body
PF: predicated region fallthrough
CT: control target
= control target key end

     0   :  { %6 = vsyncpa [#allocation3], 0  ;;  %s285_s0 = inlined_call_operand.hbm [shape: f32[32,250], index: 0, kind: input, shape index: {}]   ;;  %s286_s1 = inlined_call_operand.hbm [shape: f32[32,250], index: 1, kind: output, shape index: {}]  }
   0x1   :  { %7 = vsyncpa [#allocation4], 0  ;;  %s232_s6 = smov [#allocation2]   ;;  %s184_s10 = scalar_lea.hbm %s285_s0, 1024 }
   0x2   :  { %s13_s7 = sshll.u32 %s232_s6, 4  ;;  %p185_p0 = scmp.ne.s32.totalorder %s285_s0, %s184_s10  ;;  %s14_s7 = int_to_ptr.vmem [resolvable:$true] %s13_s7 }
   0x3   :  { %p188_p1 = scmp.lt.u32.totalorder %s184_s10, %s285_s0 }
   0x5   :  { %p190_p2 = pnand %p188_p1, %p185_p0 }
   0x7   :  { %193 = shalt.err (!%p190_p2)
}
   0x8   :  { %s194_s15 = scalar_lea.vmem %s14_s7, 1024  ;;  %p199_p4 = scmp.lt.s32.totalorder %s14_s7, %s14_s7 }
   0x9   :  { %p195_p3 = scmp.ne.s32.totalorder %s14_s7, %s194_s15  ;;  %p200_p5 = scmp.lt.s32.totalorder %s194_s15, %s194_s15 }
   0xb   :  { %p201_p6 = por %p200_p5, %p199_p4 }
   0xd   :  { %p202_p7 = pnand %p201_p6, %p195_p3 }
   0xf   :  { %205 = shalt.err (!%p202_p7)
}
  0x10   :  { %s233_s16 = smov 256   ;;  %s234_s17 = smov 16  }
  0x11   :  { %19 = dma.hbm_to_vmem [thread:$0]  %s285_s0, 1024, %s14_s7, [#allocation3], %s233_s16, %s233_s16, %s234_s17  }
  0x12   :  { %228 = dma.done.wait [#allocation3], 1024  }
  0x13   :  { %229 = vsyncadd [#allocation3], 4294966272  ;;  %vm31_vm0 = vcmask 998400   ;;  %v23_v0 = vld [vmem:[#allocation2] sm:$0xff]  ;;  %v24_v1 = vld [vmem:[#allocation2 + $0x8] sm:$0xff]  ;;  %s236_s3 = smov [#allocation5]  }
  0x14   :  { %v25_v2 = vld [vmem:[#allocation2 + $0x10] sm:$0xff]  ;;  %v26_v3 = vld [vmem:[#allocation2 + $0x18] sm:$0xff]  ;;  %v27_v4 = vld [vmem:[#allocation2 + $0x20] sm:$0xff]  ;;  %v32_v6 = vsel %vm31_vm0, %v24_v1, -inf  ;;  %s235_s21 = smov 1e-10  }
  0x15   :  { %v28_v5 = vld [vmem:[#allocation2 + $0x28] sm:$0xff]  ;;  %v29_v7 = vld [vmem:[#allocation2 + $0x30] sm:$0xff]  ;;  %v30_v8 = vld [vmem:[#allocation2 + $0x38] sm:$0xff]  ;;  %v33_v9 = vsel %vm31_vm0, %v26_v3, -inf  ;;  %v34_v10 = vmax.f32 %v23_v0, %v27_v4  ;;  %v60_v32 = vmax.f32 %v23_v0, 1e-10 }
  0x16   :  { %v35_v11 = vsel %vm31_vm0, %v28_v5, -inf  ;;  %v37_v13 = vmax.f32 %v25_v2, %v29_v7  ;;  %v38_v14 = vsel %vm31_vm0, %v30_v8, -inf  ;;  %v61_v33 = vmax.f32 %v24_v1, 1e-10  ;;  %s140_s4 = sshll.u32 %s236_s3, 4  ;;  %s141_s4 = int_to_ptr.vmem [resolvable:$true] %s140_s4 }
  0x17   :  { %v36_v12 = vmax.f32 %v32_v6, %v35_v11  ;;  %v39_v15 = vmax.f32 %v33_v9, %v38_v14  ;;  %v62_v34 = vmax.f32 %v25_v2, 1e-10  ;;  %v63_v35 = vmax.f32 %v26_v3, 1e-10  ;;  %s206_s5 = scalar_lea.vmem %s141_s4, 1024  ;;  %p211_p9 = scmp.lt.s32.totalorder %s141_s4, %s141_s4 }
  0x18   :  { %v64_v36 = vmax.f32 %v27_v4, 1e-10  ;;  %v65_v37 = vmax.f32 %v28_v5, 1e-10  ;;  %v66_v38 = vmax.f32 %v29_v7, 1e-10  ;;  %p207_p8 = scmp.ne.s32.totalorder %s141_s4, %s206_s5  ;;  %p212_p10 = scmp.lt.s32.totalorder %s206_s5, %s206_s5 }
  0x19   :  { %v40_v16 = vmax.f32 %v34_v10, %v36_v12  ;;  %v41_v17 = vmax.f32 %v37_v13, %v39_v15  ;;  %v67_v39 = vmax.f32 %v30_v8, 1e-10 }
  0x1a   :  { %p213_p11 = por %p212_p10, %p211_p9 }
  0x1b   :  { %v42_v18 = vmax.f32 %v40_v16, %v41_v17 }
  0x1c   :  { %p214_p12 = pnand %p213_p11, %p207_p8 }
  0x1d   :  { %43 = vmax.xlane.f32.xlu0 %v42_v18 }
  0xaa   :  { %v44_v19 = vpop.xlane.xlu0 %43 }
  0xab   :  { %v45_v20 = vrot.slane %v44_v19, 4 }
  0xad   :  { %v46_v21 = vmax.f32 %v44_v19, %v45_v20 }
  0xaf   :  { %v47_v22 = vrot.slane %v46_v21, 2 }
  0xb1   :  { %v48_v23 = vmax.f32 %v46_v21, %v47_v22 }
  0xb3   :  { %v49_v24 = vrot.slane %v48_v23, 1 }
  0xb5   :  { %v50_v25 = vmax.f32 %v48_v23, %v49_v24 }
  0xb7   :  { %153 = vpush %v50_v25 }
  0xe8   :  { %s154_s0 = spop %153 }
  0xe9   :  { %s52_s20 = sand.u32 2147483647, %s154_s0  ;;  %s109_s22 = smax.f32 %s235_s21, %s154_s0 }
  0xea   :  { %s53_s23 = smax.f32 %s235_s21, %s52_s20  ;;  %v110_v26 = vstv %s109_s22 }
  0xeb   :  { %v54_v27 = vstv %s53_s23  ;;  %164 = vlog2.f32 %v110_v26 }
  0xec   :  { %166 = vlog2.f32 %v54_v27 }
  0xed   :  { %168 = vlog2.f32 %v60_v32 }
  0xee   :  { %170 = vlog2.f32 %v61_v33 }
  0xef   :  { %172 = vlog2.f32 %v62_v34 }
  0xf0   :  { %174 = vlog2.f32 %v63_v35 }
  0xf1   :  { %176 = vlog2.f32 %v64_v36 }
  0xf2   :  { %178 = vlog2.f32 %v65_v37 }
  0xf3   :  { %180 = vlog2.f32 %v66_v38 }
  0xf4   :  { %182 = vlog2.f32 %v67_v39 }
  0xf5   :  { %v165_v28 = vpop.eup %164 }
  0xf6   :  { %v167_v29 = vpop.eup %166  ;;  %v112_v30 = vmul.f32 0.6931472, %v165_v28 }
  0xf7   :  { %v56_v31 = vmul.f32 0.6931472, %v167_v29  ;;  %v169_v40 = vpop.eup %168 }
  0xf8   :  { %v171_v41 = vpop.eup %170  ;;  %v69_v48 = vmul.f32 0.6931472, %v169_v40 }
  0xf9   :  { %155 = vpush %v56_v31  ;;  %v173_v42 = vpop.eup %172  ;;  %v71_v49 = vmul.f32 0.6931472, %v171_v41 }
  0xfa   :  { %157 = vpush %v112_v30  ;;  %v175_v43 = vpop.eup %174  ;;  %v73_v50 = vmul.f32 0.6931472, %v173_v42  ;;  %v84_v56 = vmul.f32 0.4342945, %v69_v48 }
  0xfb   :  { %v177_v44 = vpop.eup %176  ;;  %v75_v51 = vmul.f32 0.6931472, %v175_v43  ;;  %v85_v57 = vmul.f32 0.4342945, %v71_v49 }
  0xfc   :  { %v179_v45 = vpop.eup %178  ;;  %v77_v52 = vmul.f32 0.6931472, %v177_v44  ;;  %v86_v58 = vmul.f32 0.4342945, %v73_v50  ;;  %v92_v0 = vmul.f32 10.0, %v84_v56 }
  0xfd   :  { %v181_v46 = vpop.eup %180  ;;  %v79_v53 = vmul.f32 0.6931472, %v179_v45  ;;  %v87_v59 = vmul.f32 0.4342945, %v75_v51  ;;  %v93_v1 = vmul.f32 10.0, %v85_v57 }
  0xfe   :  { %v183_v47 = vpop.eup %182  ;;  %v81_v54 = vmul.f32 0.6931472, %v181_v46  ;;  %v88_v60 = vmul.f32 0.4342945, %v77_v52  ;;  %v94_v2 = vmul.f32 10.0, %v86_v58 }
  0xff   :  { %v83_v55 = vmul.f32 0.6931472, %v183_v47  ;;  %v89_v61 = vmul.f32 0.4342945, %v79_v53  ;;  %v95_v3 = vmul.f32 10.0, %v87_v59 }
 0x100   :  { %v90_v62 = vmul.f32 0.4342945, %v81_v54  ;;  %v96_v4 = vmul.f32 10.0, %v88_v60 }
 0x101   :  { %v91_v63 = vmul.f32 0.4342945, %v83_v55  ;;  %v97_v6 = vmul.f32 10.0, %v89_v61 }
 0x102   :  { %v98_v7 = vmul.f32 10.0, %v90_v62 }
 0x103   :  { %v99_v8 = vmul.f32 10.0, %v91_v63 }
 0x12a   :  { %s156_s24 = spop %155 }
 0x12b   :  { %s58_s25 = smul.f32 0.4342945, %s156_s24  ;;  %s158_s26 = spop %157 }
 0x12c   :  { %s114_s27 = smul.f32 0.4342945, %s158_s26 }
 0x12d   :  { %s59_s28 = smul.f32 10.0, %s58_s25 }
 0x12e   :  { %s115_s29 = smul.f32 10.0, %s114_s27 }
 0x12f   :  { %v100_v5 = vstv %s59_s28 }
 0x130   :  { %s116_s30 = ssub.f32 %s115_s29, %s59_s28  ;;  %v101_v9 = vsub.f32 %v92_v0, %v100_v5  ;;  %v102_v10 = vsub.f32 %v93_v1, %v100_v5  ;;  %v103_v11 = vsub.f32 %v94_v2, %v100_v5  ;;  %v104_v12 = vsub.f32 %v95_v3, %v100_v5 }
 0x131   :  { %v105_v13 = vsub.f32 %v96_v4, %v100_v5  ;;  %v106_v14 = vsub.f32 %v97_v6, %v100_v5  ;;  %v107_v15 = vsub.f32 %v98_v7, %v100_v5  ;;  %v108_v16 = vsub.f32 %v99_v8, %v100_v5 }
 0x132   :  { %s152_s2 = sadd.f32 -80.0, %s116_s30 }
 0x134   :  { %v118_v17 = vstv %s152_s2 }
 0x135   :  { %v119_v18 = vmax.f32 %v101_v9, %v118_v17  ;;  %v120_v19 = vmax.f32 %v102_v10, %v118_v17  ;;  %v121_v20 = vmax.f32 %v103_v11, %v118_v17  ;;  %v122_v21 = vmax.f32 %v104_v12, %v118_v17 }
 0x136   :  { %v123_v22 = vmax.f32 %v105_v13, %v118_v17  ;;  %v124_v23 = vmax.f32 %v106_v14, %v118_v17  ;;  %v125_v24 = vmax.f32 %v107_v15, %v118_v17  ;;  %v126_v25 = vmax.f32 %v108_v16, %v118_v17 }
 0x137   :  { %127 = vst [vmem:[#allocation5] sm:$0xff] %v119_v18  ;;  %128 = vst.msk [vmem:[#allocation5 + $0x8] sm:$0xff] %vm31_vm0, %v120_v19 }
 0x138   :  { %129 = vst [vmem:[#allocation5 + $0x10] sm:$0xff] %v121_v20  ;;  %130 = vst.msk [vmem:[#allocation5 + $0x18] sm:$0xff] %vm31_vm0, %v122_v21 }
 0x139   :  { %131 = vst [vmem:[#allocation5 + $0x20] sm:$0xff] %v123_v22  ;;  %132 = vst.msk [vmem:[#allocation5 + $0x28] sm:$0xff] %vm31_vm0, %v124_v23 }
 0x13a   :  { %133 = vst [vmem:[#allocation5 + $0x30] sm:$0xff] %v125_v24  ;;  %134 = vst.msk [vmem:[#allocation5 + $0x38] sm:$0xff] %vm31_vm0, %v126_v25 }
 0x13b   :  { %217 = shalt.err (!%p214_p12)
}
 0x13c   :  { %s218_s8 = scalar_lea.hbm %s286_s1, 1024 }
 0x13d   :  { %p219_p13 = scmp.ne.s32.totalorder %s286_s1, %s218_s8  ;;  %p222_p0 = scmp.lt.u32.totalorder %s218_s8, %s286_s1 }
 0x13f   :  { %p224_p1 = pnand %p222_p0, %p219_p13 }
 0x141   :  { %227 = shalt.err (!%p224_p1)
}
 0x142   :  { %146 = dma.vmem_to_hbm [thread:$0]  %s141_s4, 1024, %s286_s1, [#allocation4], %s233_s16, %s233_s16, %s234_s17  }
 0x143   :  { %230 = dma.done.wait [#allocation4], 1024  }
 0x144   :  { %231 = vsyncadd [#allocation4], 4294966272 }
 0x145   :  { %150 = vsyncpa [#allocation3], 1 }
 0x146   :  { %151 = vsyncpa [#allocation4], 1 }

</bundles_post_ra>
